<compile_context>
chip_gen: v6e
topology: v6e:2x2x1
jax: 0.10.0
libtpu: 0.0.40
codegen_flags: <defaults>
</compile_context>

<pallas_src>
import numpy as np
import jax
import jax.numpy as jnp
from jax.experimental import pallas as pl
from jax.experimental.pallas import tpu as pltpu

# ---- constants implied by the PyTorch module (Linear(16*4*8, d)) ----
N_TRACKS = 4              # constants.N_TRACKS  (conv H)
RESOLUTION = 8            # resolution*4 = 32   (conv W)
W_IN = RESOLUTION * 4     # 32
H_IN = N_TRACKS           # 4
W_POOL = W_IN // 4        # 8  (after MaxPool2d((1,4), stride (1,4)))
C1, C2 = 8, 16
IN_FLAT = H_IN * W_IN             # 128  (input lanes per bar)
CONV1_COLS = 4 * H_IN * W_POOL * C1   # 1024 (columns of conv1 Toeplitz output)
POOL_COLS = H_IN * W_POOL * C1        # 256  (columns after max-pool)
FLAT = C2 * H_IN * W_POOL             # 512  (conv2 output / lin1 input)


def _round_up(x, m):
    return (x + m - 1) // m * m


# --------------------------------------------------------------------------------------
# Fused kernel: conv1 -> pool -> bias+ReLU -> conv2 -> ReLU -> lin1 -> ReLU
#               -> folded (lin2 + bars_encoder), accumulated over the bar grid axis.
# --------------------------------------------------------------------------------------
def structure_encoder_kernel(x_ref, w1_ref, b1_ref, w2_ref, b2_ref,
                             wl1_ref, bl1_ref, wf_ref, bf_ref, o_ref):
    """Grid = (batch row blocks [parallel], bar position j [arbitrary/accumulate]).

    x_ref  : (NB, 128)  f32   one bar's flattened piano roll per batch row
    w1_ref : (128, 1024) bf16 conv1 Toeplitz, cols ordered (w%4, h, w//4, c)
    b1_ref : (1, 256)   f32   conv1 bias in pooled layout (col % 8 = c)
    w2_ref : (256, 512) bf16  conv2 Toeplitz (zero padding folded in)
    b2_ref : (1, 512)   f32
    wl1_ref: (512, d)   bf16  lin1 weight (rows permuted to kernel flatten order)
    bl1_ref: (1, d)     f32
    wf_ref : (d, 128)   bf16  folded lin2 @ bars_w block for bar j (zero-padded lanes)
    bf_ref : (1, 128)   f32   folded bias (bl2 @ sum_j bars_j + b_bars), zero-padded
    o_ref  : (NB, 128)  f32   accumulator across the bar axis
    """
    j = pl.program_id(1)
    x = x_ref[...].astype(jnp.bfloat16)                               # (NB, 128)

    # conv1 as one lane-dense MXU matmul (no bias/ReLU yet).
    h1 = jnp.dot(x, w1_ref[...], preferred_element_type=jnp.float32)  # (NB, 1024) f32

    # MaxPool2d((1,4)): cols laid out as (w%4, h, w//4, c) -> max over four 256-lane
    # chunks (all slice offsets are multiples of 128). Bias + ReLU applied once, after.
    p = jnp.maximum(jnp.maximum(h1[:, 0 * POOL_COLS:1 * POOL_COLS],
                                h1[:, 1 * POOL_COLS:2 * POOL_COLS]),
                    jnp.maximum(h1[:, 2 * POOL_COLS:3 * POOL_COLS],
                                h1[:, 3 * POOL_COLS:4 * POOL_COLS]))
    p = jnp.maximum(p + b1_ref[...], 0.0).astype(jnp.bfloat16)        # (NB, 256)

    # conv2 + bias + ReLU (output columns ARE already the flatten).
    h2 = jnp.dot(p, w2_ref[...], preferred_element_type=jnp.float32) + b2_ref[...]
    h2 = jnp.maximum(h2, 0.0).astype(jnp.bfloat16)                    # (NB, 512)

    # Dropout(eval)=id -> Linear(512, d) -> ReLU.
    h3 = jnp.dot(h2, wl1_ref[...], preferred_element_type=jnp.float32) + bl1_ref[...]
    h3 = jnp.maximum(h3, 0.0).astype(jnp.bfloat16)                    # (NB, d)

    # Dropout(eval)=id -> Linear(d, d) and bars Linear folded into one per-bar weight.
    contrib = jnp.dot(h3, wf_ref[...], preferred_element_type=jnp.float32)  # (NB, 128)

    @pl.when(j == 0)
    def _():
        o_ref[...] = bf_ref[...] + contrib

    @pl.when(j != 0)
    def _():
        o_ref[...] = o_ref[...] + contrib


# --------------------------------------------------------------------------------------
# pallas_call wrapper
# --------------------------------------------------------------------------------------
def structure_encoder_forward(s_tensor, p, d, n_bars, *, block_rows=1024):
    """StructureEncoder.forward.  s_tensor: (B, n_bars, N_TRACKS, resolution*4) -> (B, d)."""
    B = s_tensor.shape[0]
    out_pad = p["w_fold"].shape[1]                       # lane-dense output width (>=128)

    # (B, n_bars, 4, 32) -> (B, n_bars*128): contiguous, free metadata reshape.
    x = s_tensor.reshape(B, n_bars * IN_FLAT)

    # Pad batch only up to a sublane multiple (<= 7 extra rows).
    B_pad = max(_round_up(B, 8), 8)
    if B_pad != B:
        x = jnp.pad(x, ((0, B_pad - B), (0, 0)))

    nbb = min(block_rows, B_pad)
    if B_pad >= 16:   # keep >= 2 parallel row blocks so both v7x TensorCores get work
        nbb = min(nbb, _round_up((B_pad + 1) // 2, 8))
    grid = (pl.cdiv(B_pad, nbb), n_bars)

    flops = 2 * B_pad * n_bars * (IN_FLAT * CONV1_COLS + POOL_COLS * FLAT
                                  + FLAT * d + d * out_pad)
    bytes_accessed = (4 * B_pad * n_bars * IN_FLAT + 4 * B_pad * out_pad
                      + sum(int(np.prod(p[k].shape)) * p[k].dtype.itemsize for k in p))

    out = pl.pallas_call(
        structure_encoder_kernel,
        out_shape=jax.ShapeDtypeStruct((B_pad, out_pad), jnp.float32),
        grid=grid,
        in_specs=[
            pl.BlockSpec((nbb, IN_FLAT), lambda i, j: (i, j)),        # bar j's 128 lanes
            pl.BlockSpec(p["w1t"].shape, lambda i, j: (0, 0)),
            pl.BlockSpec(p["b1p"].shape, lambda i, j: (0, 0)),
            pl.BlockSpec(p["w2t"].shape, lambda i, j: (0, 0)),
            pl.BlockSpec(p["b2t"].shape, lambda i, j: (0, 0)),
            pl.BlockSpec(p["w_lin1"].shape, lambda i, j: (0, 0)),
            pl.BlockSpec(p["b_lin1"].shape, lambda i, j: (0, 0)),
            pl.BlockSpec((d, out_pad), lambda i, j: (j, 0)),          # folded bar-j weight
            pl.BlockSpec(p["b_fold"].shape, lambda i, j: (0, 0)),
        ],
        out_specs=pl.BlockSpec((nbb, out_pad), lambda i, j: (i, 0)),  # resident across j
        compiler_params=pltpu.CompilerParams(
            dimension_semantics=("parallel", "arbitrary"),
            vmem_limit_bytes=48 * 1024 * 1024),
        cost_estimate=pl.CostEstimate(flops=int(flops), transcendentals=0,
                                      bytes_accessed=int(bytes_accessed)),
    )(x, p["w1t"], p["b1p"], p["w2t"], p["b2t"],
      p["w_lin1"], p["b_lin1"], p["w_fold"], p["b_fold"])

    return out[:B, :d]


# --------------------------------------------------------------------------------------
# Host-side parameter re-layout (done once; pure re-layout / fold of PyTorch weights)
# --------------------------------------------------------------------------------------
def make_kernel_params(conv1_w, conv1_b, conv2_w, conv2_b,
                       lin1_w, lin1_b, lin2_w, lin2_b, bars_w, bars_b, d, n_bars):
    assert d % 8 == 0, "d must be a multiple of 8 for the folded bar-weight BlockSpec"
    c1w = np.asarray(conv1_w).astype(np.float32)          # (8, 1, 3, 3)
    c2w = np.asarray(conv2_w).astype(np.float32)          # (16, 8, 3, 3)

    # conv1 Toeplitz: row = h*32 + w ; col = (w%4)*256 + h*64 + (w//4)*8 + c
    w1t = np.zeros((IN_FLAT, CONV1_COLS), np.float32)
    for c in range(C1):
        for h in range(H_IN):
            for w in range(W_IN):
                wp, wi = w // 4, w % 4
                col = wi * POOL_COLS + h * (W_POOL * C1) + wp * C1 + c
                for kh in range(3):
                    for kw in range(3):
                        hi, wj = h + kh - 1, w + kw - 1
                        if 0 <= hi < H_IN and 0 <= wj < W_IN:
                            w1t[hi * W_IN + wj, col] = c1w[c, 0, kh, kw]
    # bias in pooled layout (pooled col = h*64 + wp*8 + c  ->  col % 8 = c)
    b1p = np.asarray(conv1_b).astype(np.float32)[np.arange(POOL_COLS) % C1].reshape(1, -1)

    # conv2 Toeplitz: row = h'*64 + w'*8 + ci ; col = h*128 + w*16 + co
    w2t = np.zeros((POOL_COLS, FLAT), np.float32)
    for co in range(C2):
        for h in range(H_IN):
            for wp in range(W_POOL):
                col = h * (W_POOL * C2) + wp * C2 + co
                for kh in range(3):
                    for kw in range(3):
                        hi, wj = h + kh - 1, wp + kw - 1
                        if 0 <= hi < H_IN and 0 <= wj < W_POOL:
                            for ci in range(C1):
                                w2t[hi * (W_POOL * C1) + wj * C1 + ci, col] = c2w[co, ci, kh, kw]
    b2t = np.asarray(conv2_b).astype(np.float32)[np.arange(FLAT) % C2].reshape(1, -1)

    # lin1: kernel flatten m = h*128 + w*16 + c  <->  torch flatten t = c*32 + h*8 + w
    m = np.arange(FLAT)
    h_idx, w_idx, c_idx = m // (W_POOL * C2), (m // C2) % W_POOL, m % C2
    perm = c_idx * (H_IN * W_POOL) + h_idx * W_POOL + w_idx
    w_lin1 = np.asarray(lin1_w).astype(np.float32).T[perm]              # (512, d)

    # Fold lin2 + bars_encoder (no nonlinearity between them):
    #   out[b] = sum_j h3[b,j] @ (wl2 @ Bj) + (bl2 @ sum_j Bj + b_bars),  Bj = bars_w.T[j*d:(j+1)*d]
    out_pad = _round_up(max(d, 128), 128)
    wl2 = np.asarray(lin2_w).astype(np.float32).T                       # (d, d)
    wb = np.asarray(bars_w).astype(np.float32).T                        # (n_bars*d, d)
    w_fold = np.zeros((n_bars * d, out_pad), np.float32)
    for j in range(n_bars):
        w_fold[j * d:(j + 1) * d, :d] = wl2 @ wb[j * d:(j + 1) * d, :]
    b_fold = np.zeros((1, out_pad), np.float32)
    b_fold[0, :d] = (np.asarray(lin2_b).astype(np.float32)
                     @ wb.reshape(n_bars, d, d).sum(0)
                     + np.asarray(bars_b).astype(np.float32))

    return dict(
        w1t=jnp.asarray(w1t, jnp.bfloat16),
        b1p=jnp.asarray(b1p, jnp.float32),
        w2t=jnp.asarray(w2t, jnp.bfloat16),
        b2t=jnp.asarray(b2t, jnp.float32),
        w_lin1=jnp.asarray(w_lin1, jnp.bfloat16),
        b_lin1=jnp.asarray(np.asarray(lin1_b).astype(np.float32).reshape(1, d)),
        w_fold=jnp.asarray(w_fold, jnp.bfloat16),
        b_fold=jnp.asarray(b_fold, jnp.float32),
    )


# --------------------------------------------------------------------------------------
# Pure-JAX reference (PyTorch layouts / NCHW), used as a smoke check
# --------------------------------------------------------------------------------------
def reference_forward(s_tensor, p, d, n_bars):
    B = s_tensor.shape[0]
    x = s_tensor.reshape(-1, N_TRACKS, W_IN)[:, None, :, :]            # (N,1,4,32)
    y = jax.lax.conv_general_dilated(x, p["conv1_w"], (1, 1), ((1, 1), (1, 1)),
                                     dimension_numbers=("NCHW", "OIHW", "NCHW"))
    y = jnp.maximum(y + p["conv1_b"][None, :, None, None], 0.0)
    y = jax.lax.reduce_window(y, -jnp.inf, jax.lax.max, (1, 1, 1, 4), (1, 1, 1, 4), "VALID")
    y = jax.lax.conv_general_dilated(y, p["conv2_w"], (1, 1), ((1, 1), (1, 1)),
                                     dimension_numbers=("NCHW", "OIHW", "NCHW"))
    y = jnp.maximum(y + p["conv2_b"][None, :, None, None], 0.0)
    y = y.reshape(y.shape[0], -1)                                      # torch flatten (c,h,w)
    y = jnp.maximum(y @ p["lin1_w"].T + p["lin1_b"], 0.0)
    y = y @ p["lin2_w"].T + p["lin2_b"]
    y = y.reshape(B, n_bars * d)
    return y @ p["bars_w"].T + p["bars_b"]


# --------------------------------------------------------------------------------------
if __name__ == "__main__":
    B, n_bars, d = 2, 2, 32                                            # small, forward-consistent sizes

    key = jax.random.PRNGKey(0)
    ks = jax.random.split(key, 11)

    def init(k, shape, scale=0.1):
        return jax.random.normal(k, shape, jnp.float32) * scale

    # PyTorch-layout parameters (deterministic synthetic init)
    conv1_w = init(ks[0], (C1, 1, 3, 3));   conv1_b = init(ks[1], (C1,))
    conv2_w = init(ks[2], (C2, C1, 3, 3));  conv2_b = init(ks[3], (C2,))
    lin1_w = init(ks[4], (d, FLAT));        lin1_b = init(ks[5], (d,))
    lin2_w = init(ks[6], (d, d));           lin2_b = init(ks[7], (d,))
    bars_w = init(ks[8], (d, n_bars * d));  bars_b = init(ks[9], (d,))

    params = make_kernel_params(conv1_w, conv1_b, conv2_w, conv2_b,
                                lin1_w, lin1_b, lin2_w, lin2_b, bars_w, bars_b,
                                d, n_bars)

    s_tensor = jax.random.normal(ks[10], (B, n_bars, N_TRACKS, W_IN), jnp.float32)

    z_s = structure_encoder_forward(s_tensor, params, d, n_bars)
    z_s = jax.block_until_ready(z_s)
    assert z_s.shape == (B, d), z_s.shape

    torch_p = dict(conv1_w=conv1_w, conv1_b=conv1_b, conv2_w=conv2_w, conv2_b=conv2_b,
                   lin1_w=lin1_w, lin1_b=lin1_b, lin2_w=lin2_w, lin2_b=lin2_b,
                   bars_w=bars_w, bars_b=bars_b)
    with jax.default_matmul_precision("highest"):
        ref = reference_forward(s_tensor, torch_p, d, n_bars)
    ref = jax.block_until_ready(ref)
    err = float(jnp.max(jnp.abs(z_s - ref)))
    # bf16 weights/activations with f32 accumulation vs. an all-f32 reference:
    # tolerance relaxed accordingly (outputs are O(0.1); layout bugs would be O(0.1)).
    assert err < 3e-2, f"mismatch vs reference: {err}"
    print("KERNEL_OK")
</pallas_src>

<mosaic_0001>
module attributes {stable_mosaic.version = 11 : i64} {
  func.func @structure_encoder_kernel(%arg0: i32, %arg1: i32, %arg2: memref<8x128xf32, #tpu.memory_space<vmem>>, %arg3: memref<128x1024xbf16, #tpu.memory_space<vmem>>, %arg4: memref<1x256xf32, #tpu.memory_space<vmem>>, %arg5: memref<256x512xbf16, #tpu.memory_space<vmem>>, %arg6: memref<1x512xf32, #tpu.memory_space<vmem>>, %arg7: memref<512x32xbf16, #tpu.memory_space<vmem>>, %arg8: memref<1x32xf32, #tpu.memory_space<vmem>>, %arg9: memref<32x128xbf16, #tpu.memory_space<vmem>>, %arg10: memref<1x128xf32, #tpu.memory_space<vmem>>, %arg11: memref<8x128xf32, #tpu.memory_space<vmem>>) attributes {dimension_semantics = [#tpu.dimension_semantics<parallel>, #tpu.dimension_semantics<arbitrary>], iteration_bounds = array<i64: 1, 2>, scalar_prefetch = 0 : i64, scratch_operands = 0 : i64, tpu.core_type = #tpu.core_type<tc>, window_params = [{transform_indices = @transform_0, window_bounds = array<i64: 8, 128>}, {pipeline_mode = #tpu.pipeline_mode<synchronous>, transform_indices = @transform_1, window_bounds = array<i64: 128, 1024>}, {pipeline_mode = #tpu.pipeline_mode<synchronous>, transform_indices = @transform_2, window_bounds = array<i64: 1, 256>}, {pipeline_mode = #tpu.pipeline_mode<synchronous>, transform_indices = @transform_3, window_bounds = array<i64: 256, 512>}, {pipeline_mode = #tpu.pipeline_mode<synchronous>, transform_indices = @transform_4, window_bounds = array<i64: 1, 512>}, {pipeline_mode = #tpu.pipeline_mode<synchronous>, transform_indices = @transform_5, window_bounds = array<i64: 512, 32>}, {pipeline_mode = #tpu.pipeline_mode<synchronous>, transform_indices = @transform_6, window_bounds = array<i64: 1, 32>}, {transform_indices = @transform_7, window_bounds = array<i64: 32, 128>}, {pipeline_mode = #tpu.pipeline_mode<synchronous>, transform_indices = @transform_8, window_bounds = array<i64: 1, 128>}, {transform_indices = @transform_9, window_bounds = array<i64: 8, 128>}]} {
    %c0 = arith.constant 0 : index
    %c0_0 = arith.constant 0 : index
    %0 = vector.load %arg2[%c0, %c0_0] : memref<8x128xf32, #tpu.memory_space<vmem>>, vector<8x128xf32>
    %1 = arith.truncf %0 : vector<8x128xf32> to vector<8x128xbf16>
    %c0_1 = arith.constant 0 : index
    %c0_2 = arith.constant 0 : index
    %2 = vector.load %arg3[%c0_1, %c0_2] : memref<128x1024xbf16, #tpu.memory_space<vmem>>, vector<128x1024xbf16>
    %cst = arith.constant dense<0.000000e+00> : vector<8x1024xf32>
    %3 = tpu.matmul %1, %2, %cst {dimension_numbers = #tpu.dot_dimension_numbers<[1], [0], [0], [1], [0, 0, 1, 1], [], []>} : vector<8x128xbf16>, vector<128x1024xbf16>, vector<8x1024xf32> -> vector<8x1024xf32>
    %4 = vector.extract_strided_slice %3 {offsets = [0, 0], sizes = [8, 256], strides = [1, 1]} : vector<8x1024xf32> to vector<8x256xf32>
    %5 = vector.extract_strided_slice %3 {offsets = [0, 256], sizes = [8, 256], strides = [1, 1]} : vector<8x1024xf32> to vector<8x256xf32>
    %6 = arith.maximumf %4, %5 : vector<8x256xf32>
    %7 = vector.extract_strided_slice %3 {offsets = [0, 512], sizes = [8, 256], strides = [1, 1]} : vector<8x1024xf32> to vector<8x256xf32>
    %8 = vector.extract_strided_slice %3 {offsets = [0, 768], sizes = [8, 256], strides = [1, 1]} : vector<8x1024xf32> to vector<8x256xf32>
    %9 = arith.maximumf %7, %8 : vector<8x256xf32>
    %10 = arith.maximumf %6, %9 : vector<8x256xf32>
    %c0_3 = arith.constant 0 : index
    %c0_4 = arith.constant 0 : index
    %11 = vector.load %arg4[%c0_3, %c0_4] : memref<1x256xf32, #tpu.memory_space<vmem>>, vector<1x256xf32>
    %12 = vector.broadcast %11 : vector<1x256xf32> to vector<8x256xf32>
    %13 = arith.addf %10, %12 : vector<8x256xf32>
    %cst_5 = arith.constant 0.000000e+00 : f32
    %14 = vector.broadcast %cst_5 : f32 to vector<8x256xf32>
    %15 = arith.maximumf %13, %14 : vector<8x256xf32>
    %16 = arith.truncf %15 : vector<8x256xf32> to vector<8x256xbf16>
    %c0_6 = arith.constant 0 : index
    %c0_7 = arith.constant 0 : index
    %17 = vector.load %arg5[%c0_6, %c0_7] : memref<256x512xbf16, #tpu.memory_space<vmem>>, vector<256x512xbf16>
    %cst_8 = arith.constant dense<0.000000e+00> : vector<8x512xf32>
    %18 = tpu.matmul %16, %17, %cst_8 {dimension_numbers = #tpu.dot_dimension_numbers<[1], [0], [0], [1], [0, 0, 1, 1], [], []>} : vector<8x256xbf16>, vector<256x512xbf16>, vector<8x512xf32> -> vector<8x512xf32>
    %c0_9 = arith.constant 0 : index
    %c0_10 = arith.constant 0 : index
    %19 = vector.load %arg6[%c0_9, %c0_10] : memref<1x512xf32, #tpu.memory_space<vmem>>, vector<1x512xf32>
    %20 = vector.broadcast %19 : vector<1x512xf32> to vector<8x512xf32>
    %21 = arith.addf %18, %20 : vector<8x512xf32>
    %cst_11 = arith.constant 0.000000e+00 : f32
    %22 = vector.broadcast %cst_11 : f32 to vector<8x512xf32>
    %23 = arith.maximumf %21, %22 : vector<8x512xf32>
    %24 = arith.truncf %23 : vector<8x512xf32> to vector<8x512xbf16>
    %c0_12 = arith.constant 0 : index
    %c0_13 = arith.constant 0 : index
    %25 = vector.load %arg7[%c0_12, %c0_13] : memref<512x32xbf16, #tpu.memory_space<vmem>>, vector<512x32xbf16>
    %cst_14 = arith.constant dense<0.000000e+00> : vector<8x32xf32>
    %26 = tpu.matmul %24, %25, %cst_14 {dimension_numbers = #tpu.dot_dimension_numbers<[1], [0], [0], [1], [0, 0, 1, 1], [], []>} : vector<8x512xbf16>, vector<512x32xbf16>, vector<8x32xf32> -> vector<8x32xf32>
    %c0_15 = arith.constant 0 : index
    %c0_16 = arith.constant 0 : index
    %27 = vector.load %arg8[%c0_15, %c0_16] : memref<1x32xf32, #tpu.memory_space<vmem>>, vector<1x32xf32>
    %28 = vector.broadcast %27 : vector<1x32xf32> to vector<8x32xf32>
    %29 = arith.addf %26, %28 : vector<8x32xf32>
    %cst_17 = arith.constant 0.000000e+00 : f32
    %30 = vector.broadcast %cst_17 : f32 to vector<8x32xf32>
    %31 = arith.maximumf %29, %30 : vector<8x32xf32>
    %32 = arith.truncf %31 : vector<8x32xf32> to vector<8x32xbf16>
    %c0_18 = arith.constant 0 : index
    %c0_19 = arith.constant 0 : index
    %33 = vector.load %arg9[%c0_18, %c0_19] : memref<32x128xbf16, #tpu.memory_space<vmem>>, vector<32x128xbf16>
    %cst_20 = arith.constant dense<0.000000e+00> : vector<8x128xf32>
    %34 = tpu.matmul %32, %33, %cst_20 {dimension_numbers = #tpu.dot_dimension_numbers<[1], [0], [0], [1], [0, 0, 1, 1], [], []>} : vector<8x32xbf16>, vector<32x128xbf16>, vector<8x128xf32> -> vector<8x128xf32>
    %c0_i32 = arith.constant 0 : i32
    %35 = arith.cmpi eq, %arg1, %c0_i32 : i32
    %36 = arith.extui %35 : i1 to i32
    %c0_i32_21 = arith.constant 0 : i32
    %37 = arith.cmpi ne, %36, %c0_i32_21 : i32
    scf.if %37 {
      %c0_24 = arith.constant 0 : index
      %c0_25 = arith.constant 0 : index
      %41 = vector.load %arg10[%c0_24, %c0_25] : memref<1x128xf32, #tpu.memory_space<vmem>>, vector<1x128xf32>
      %42 = vector.broadcast %41 : vector<1x128xf32> to vector<8x128xf32>
      %43 = arith.addf %42, %34 : vector<8x128xf32>
      %c0_26 = arith.constant 0 : index
      %c0_27 = arith.constant 0 : index
      %44 = vector.load %arg11[%c0_26, %c0_27] : memref<8x128xf32, #tpu.memory_space<vmem>>, vector<8x128xf32>
      tpu.vector_store %arg11[%c0_26, %c0_27], %43 {strides = array<i32>} : memref<8x128xf32, #tpu.memory_space<vmem>>, vector<8x128xf32>,
    } else {
    }
    %c0_i32_22 = arith.constant 0 : i32
    %38 = arith.cmpi ne, %arg1, %c0_i32_22 : i32
    %39 = arith.extui %38 : i1 to i32
    %c0_i32_23 = arith.constant 0 : i32
    %40 = arith.cmpi ne, %39, %c0_i32_23 : i32
    scf.if %40 {
      %c0_24 = arith.constant 0 : index
      %c0_25 = arith.constant 0 : index
      %41 = vector.load %arg11[%c0_24, %c0_25] : memref<8x128xf32, #tpu.memory_space<vmem>>, vector<8x128xf32>
      %42 = arith.addf %41, %34 : vector<8x128xf32>
      %c0_26 = arith.constant 0 : index
      %c0_27 = arith.constant 0 : index
      %43 = vector.load %arg11[%c0_26, %c0_27] : memref<8x128xf32, #tpu.memory_space<vmem>>, vector<8x128xf32>
      tpu.vector_store %arg11[%c0_26, %c0_27], %42 {strides = array<i32>} : memref<8x128xf32, #tpu.memory_space<vmem>>, vector<8x128xf32>,
    } else {
    }
    return
  }
  func.func @transform_0(%arg0: i32, %arg1: i32) -> (i32, i32) {
    %c0_i32 = arith.constant 0 : i32
    return %arg0, %arg1 : i32, i32
  }
  func.func @transform_1(%arg0: i32, %arg1: i32) -> (i32, i32) {
    %c0_i32 = arith.constant 0 : i32
    %c0_i32_0 = arith.constant 0 : i32
    %c0_i32_1 = arith.constant 0 : i32
    return %c0_i32, %c0_i32_0 : i32, i32
  }
  func.func @transform_2(%arg0: i32, %arg1: i32) -> (i32, i32) {
    %c0_i32 = arith.constant 0 : i32
    %c0_i32_0 = arith.constant 0 : i32
    %c0_i32_1 = arith.constant 0 : i32
    return %c0_i32, %c0_i32_0 : i32, i32
  }
  func.func @transform_3(%arg0: i32, %arg1: i32) -> (i32, i32) {
    %c0_i32 = arith.constant 0 : i32
    %c0_i32_0 = arith.constant 0 : i32
    %c0_i32_1 = arith.constant 0 : i32
    return %c0_i32, %c0_i32_0 : i32, i32
  }
  func.func @transform_4(%arg0: i32, %arg1: i32) -> (i32, i32) {
    %c0_i32 = arith.constant 0 : i32
    %c0_i32_0 = arith.constant 0 : i32
    %c0_i32_1 = arith.constant 0 : i32
    return %c0_i32, %c0_i32_0 : i32, i32
  }
  func.func @transform_5(%arg0: i32, %arg1: i32) -> (i32, i32) {
    %c0_i32 = arith.constant 0 : i32
    %c0_i32_0 = arith.constant 0 : i32
    %c0_i32_1 = arith.constant 0 : i32
    return %c0_i32, %c0_i32_0 : i32, i32
  }
  func.func @transform_6(%arg0: i32, %arg1: i32) -> (i32, i32) {
    %c0_i32 = arith.constant 0 : i32
    %c0_i32_0 = arith.constant 0 : i32
    %c0_i32_1 = arith.constant 0 : i32
    return %c0_i32, %c0_i32_0 : i32, i32
  }
  func.func @transform_7(%arg0: i32, %arg1: i32) -> (i32, i32) {
    %c0_i32 = arith.constant 0 : i32
    %c0_i32_0 = arith.constant 0 : i32
    return %arg1, %c0_i32 : i32, i32
  }
  func.func @transform_8(%arg0: i32, %arg1: i32) -> (i32, i32) {
    %c0_i32 = arith.constant 0 : i32
    %c0_i32_0 = arith.constant 0 : i32
    %c0_i32_1 = arith.constant 0 : i32
    return %c0_i32, %c0_i32_0 : i32, i32
  }
  func.func @transform_9(%arg0: i32, %arg1: i32) -> (i32, i32) {
    %c0_i32 = arith.constant 0 : i32
    %c0_i32_0 = arith.constant 0 : i32
    return %arg0, %c0_i32 : i32, i32
  }
}

</mosaic_0001>

<bundles_post_ra>
// kernel: tpu_custom_call.1
= control target key start
LH: loop header
LB: loop body
LE: loop exit
PB: predicated region body
PF: predicated region fallthrough
CT: control target
= control target key end

     0   :  { %14 = vsyncpa [#allocation3], 0  ;;  %s2828_s0 = inlined_call_operand.vmem [shape: f32[8,256], index: 0, kind: input, shape index: {}]   ;;  %s2829_s1 = inlined_call_operand.hbm [shape: bf16[128,1024], index: 1, kind: input, shape index: {}]   ;;  %s2830_s2 = inlined_call_operand.vmem [shape: f32[1,256], index: 2, kind: input, shape index: {}]   ;;  %s2831_s3 = inlined_call_operand.hbm [shape: bf16[256,512], index: 3, kind: input, shape index: {}]   ;;  %s2832_s4 = inlined_call_operand.vmem [shape: f32[1,512], index: 4, kind: input, shape index: {}]   ;;  %s2833_s5 = inlined_call_operand.vmem [shape: bf16[512,32], index: 5, kind: input, shape index: {}]   ;;  %s2834_s6 = inlined_call_operand.vmem [shape: f32[1,32], index: 6, kind: input, shape index: {}]   ;;  %s2835_s7 = inlined_call_operand.vmem [shape: bf16[64,128], index: 7, kind: input, shape index: {}]   ;;  %s2836_s8 = inlined_call_operand.vmem [shape: f32[1,128], index: 8, kind: input, shape index: {}]   ;;  %s2837_s9 = inlined_call_operand.hbm [shape: f32[8,128], index: 9, kind: output, shape index: {}]  }
   0x1   :  { %15 = vsyncpa [#allocation6], 0 }
   0x2   :  { %16 = vsyncpa [#allocation4], 0  ;;  %s2592_s30 = smov 0   ;;  %s2594_s10 = smov 0  }
   0x3   :  { %s2596_s11 = smov 0  }
   0x4 LB: > { %s1994_s12 = sadd.s32 4294967295, %s2530_s11   ;;  %s31_s13 = sadd.s32 1, %s2526_s10  ;;  %s2530_s11 = sphi %s2596_s11, %s22_s11   ;;  %s2526_s10 = sphi %s2594_s10, %s2843_s10   ;;  %s2522_s30 = sphi %s2592_s30, %s2842_s30  }
   0x5   : > { %p32_p0 = scmp.ge.s32.totalorder %s31_s13, 2  ;;  %p1995_p1 = scmp.ge.s32.totalorder %s2530_s11, 1 }
   0x6   : > { %p266_p2 = scmp.lt.s32.totalorder %s2530_s11, 3  ;;  %p2619_p4 = scmp.eq.s32.totalorder %s1994_s12, 0 }
   0x7   : > { %s2845_s13 = smov (%p32_p0, %s31_s13), 0  ;;  %s2532_s16 = smov [#allocation2]  }
   0x8   : > { %p2613_p3 = pnand %p1995_p1, %p266_p2  ;;  %s278_s17 = sshll.u32 %s2532_s16, 4  ;;  %s279_s17 = int_to_ptr.vmem [resolvable:$true] %s278_s17 }
   0x9   : > { %s2533_s19 = smov [#allocation5]   ;;  %s2431_s21 = scalar_lea.vmem %s279_s17, 8192 }
   0xa   : > { %p2243_p5 = pneg %p2613_p3  ;;  %s294_s20 = sshll.u32 %s2533_s19, 4  ;;  %s295_s20 = int_to_ptr.vmem [resolvable:$true] %s294_s20 }
   0xb   : > { %p2432_p8 = scmp.ne.s32.totalorder %s279_s17, %s2431_s21  ;;  %p2439_p11 = scmp.lt.s32.totalorder %s279_s17, %s279_s17 }
   0xc   : > { %p2627_p6 = pnand %p2619_p4, %p2243_p5  ;;  %p2440_p12 = scmp.lt.s32.totalorder %s2431_s21, %s2431_s21 }
   0xe   : > { %p2422_p7 = pneg %p2627_p6  ;;  %p2441_p13 = por %p2440_p12, %p2439_p11 }
  0x10   : > { %p2434_p9 = pnand %p2432_p8, %p2422_p7 }
  0x12   : > { %p2435_p10 = pneg %p2434_p9 }
  0x14   : > { %p2442_p0 = pnand %p2441_p13, %p2435_p10 }
  0x16   : > { %2445 = shalt.err (!%p2442_p0)
}
  0x17   : > { %s2534_s22 = smov 512   ;;  %s2535_s23 = smov 32  }
  0x18   : > { %2246 = dma.hbm_to_vmem [thread:$0]  (!%p2627_p6), %s2829_s1, 8192, %s279_s17, [#allocation3], %s2534_s22, %s2534_s22, %s2535_s23  }
  0x19   : > { %s2457_s26 = scalar_lea.vmem %s295_s20, 8192  ;;  %p2465_p8 = scmp.lt.s32.totalorder %s295_s20, %s295_s20 }
  0x1a   : > { %p2458_p1 = scmp.ne.s32.totalorder %s295_s20, %s2457_s26  ;;  %p2466_p9 = scmp.lt.s32.totalorder %s2457_s26, %s2457_s26 }
  0x1c   : > { %p2460_p2 = pnand %p2458_p1, %p2422_p7  ;;  %p2467_p11 = por %p2466_p9, %p2465_p8 }
  0x1e   : > { %p2461_p5 = pneg %p2460_p2 }
  0x20   : > { %p2468_p10 = pnand %p2467_p11, %p2461_p5 }
  0x22   : > { %2471 = shalt.err (!%p2468_p10)
}
  0x23   : > { %s2536_s27 = smov 256   ;;  %s2537_s28 = smov 16  }
  0x24   : > { %2249 = dma.hbm_to_vmem [thread:$0]  (!%p2627_p6), %s2831_s3, 8192, %s295_s20, [#allocation6], %s2536_s27, %s2536_s27, %s2537_s28  }
  0x25   : > { %342 = sbr.rel (%p2613_p3) target bundleno = 955 (0x3bb), region = 56 }
  0x2a   : > { %2509 = dma.done.wait (%p2619_p4), [#allocation3], 8192  }
  0x2b   : > { %2511 = vsyncadd (%p2619_p4), [#allocation3], 4294959104 }
  0x2c   : > { %2513 = dma.done.wait (%p2619_p4), [#allocation6], 8192  }
  0x2d   : > { %2515 = vsyncadd (%p2619_p4), [#allocation6], 4294959104  ;;  %v2538_v0 = vmov 0   ;;  %v458_v1 = vld [vmem:[#allocation2 + $0x1c0] sm:$0xff]  ;;  %v459_v3 = vld [vmem:[#allocation2 + $0x1c8] sm:$0xff]  ;;  %p387_p3 = scmp.lt.s32.totalorder %s2522_s30, 1 }
  0x2e   : > { %818 = vmatprep.mubr.bf16.mxu0 %v2538_v0  ;;  %859 = vmatprep.mubr.bf16.mxu1 %v2538_v0  ;;  %v462_v2 = vld [vmem:[#allocation2 + $0x1e0] sm:$0xff]  ;;  %v463_v5 = vld [vmem:[#allocation2 + $0x1e8] sm:$0xff]  ;;  %v460_v62 = vld [vmem:[#allocation2 + $0x1d0] sm:$0xff]  ;;  %s2003_s24 = sshll.u32 %s2522_s30, 2  ;;  %vm2540_vm0 = vmmov 0   ;;  %vm1831_vm1 = vcmask 261120  }
  0x2f   : > { %v2062_v4 = vcombine.high %v458_v1, %v462_v2  ;;  %v2061_v6 = vcombine.low %v458_v1, %v462_v2  ;;  %v450_v7 = vld [vmem:[#allocation2 + $0x180] sm:$0xff]  ;;  %v2064_v9 = vcombine.high %v459_v3, %v463_v5  ;;  %v2063_v10 = vcombine.low %v459_v3, %v463_v5  ;;  %v451_v12 = vld [vmem:[#allocation2 + $0x188] sm:$0xff]  ;;  %s388_s14 = scalar_select %p387_p3, %s2522_s30, 1  ;;  %v464_v1 = vld [vmem:[#allocation2 + $0x1f0] sm:$0xff] }
  0x30   : > { %v454_v8 = vld [vmem:[#allocation2 + $0x1a0] sm:$0xff]  ;;  %v455_v13 = vld [vmem:[#allocation2 + $0x1a8] sm:$0xff]  ;;  %v461_v2 = vld [vmem:[#allocation2 + $0x1d8] sm:$0xff]  ;;  %p394_p4 = scmp.lt.s32.totalorder %s2003_s24, 7  ;;  %p2169_p6 = scmp.ne.s32.totalorder %s2522_s30, 0 }
  0x31   : > { %v2054_v11 = vcombine.high %v450_v7, %v454_v8  ;;  %v442_v14 = vld [vmem:[#allocation2 + $0x140] sm:$0xff]  ;;  %786 = vmatprep.subr.bf16.mxu0 %v2062_v4  ;;  %v2056_v15 = vcombine.high %v451_v12, %v455_v13  ;;  %v443_v17 = vld [vmem:[#allocation2 + $0x148] sm:$0xff]  ;;  %827 = vmatprep.subr.bf16.mxu1 %v2064_v9  ;;  %v2053_v19 = vcombine.low %v450_v7, %v454_v8  ;;  %s2002_s15 = sshll.u32 %s388_s14, 3  ;;  %v465_v3 = vld [vmem:[#allocation2 + $0x1f8] sm:$0xff] }
  0x32   : > { %v446_v16 = vld [vmem:[#allocation2 + $0x160] sm:$0xff]  ;;  %v447_v18 = vld [vmem:[#allocation2 + $0x168] sm:$0xff]  ;;  %787 = vmatpush1.bf16.msra.mxu0 %v2061_v6  ;;  %828 = vmatpush1.bf16.msra.mxu1 %v2063_v10  ;;  %v2055_v20 = vcombine.low %v451_v12, %v455_v13  ;;  %s392_s19 = scalar_lea.vmem %s2828_s0, %s2002_s15  ;;  %v2066_v7 = vcombine.high %v460_v62, %v464_v1  ;;  %v452_v8 = vld [vmem:[#allocation2 + $0x190] sm:$0xff]  ;;  %v2068_v9 = vcombine.high %v461_v2, %v465_v3  ;;  %s2847_s24 = smov (!%p394_p4, %s2003_s24), 7 }
  0x33   : > { %788 = vmatprep.subr.bf16.mxu0 %v2054_v11  ;;  %v2046_v21 = vcombine.high %v442_v14, %v446_v16  ;;  %829 = vmatprep.subr.bf16.mxu1 %v2056_v15  ;;  %v2048_v22 = vcombine.high %v443_v17, %v447_v18  ;;  %v434_v23 = vld [vmem:[#allocation2 + $0x100] sm:$0xff]  ;;  %v435_v25 = vld [vmem:[#allocation2 + $0x108] sm:$0xff]  ;;  %v2045_v27 = vcombine.low %v442_v14, %v446_v16  ;;  %v456_v10 = vld [vmem:[#allocation2 + $0x1b0] sm:$0xff]  ;;  %s2004_s25 = sshll.u32 %s2847_s24, 2 }
  0x34   : > { %v438_v24 = vld [vmem:[#allocation2 + $0x120] sm:$0xff]  ;;  %v439_v26 = vld [vmem:[#allocation2 + $0x128] sm:$0xff]  ;;  %v2047_v28 = vcombine.low %v443_v17, %v447_v18  ;;  %v453_v11 = vld [vmem:[#allocation2 + $0x198] sm:$0xff]  ;;  %v2065_v14 = vcombine.low %v460_v62, %v464_v1  ;;  %v2067_v15 = vcombine.low %v461_v2, %v465_v3  ;;  %v2058_v16 = vcombine.high %v452_v8, %v456_v10  ;;  %s397_s28 = scalar_lea.vmem %s2835_s7, %s2004_s25 }
  0x35   : > { %v2038_v29 = vcombine.high %v434_v23, %v438_v24  ;;  %v2040_v30 = vcombine.high %v435_v25, %v439_v26  ;;  %v426_v31 = vld [vmem:[#allocation2 + $0xc0] sm:$0xff]  ;;  %v427_v33 = vld [vmem:[#allocation2 + $0xc8] sm:$0xff]  ;;  %v2037_v35 = vcombine.low %v434_v23, %v438_v24  ;;  %v2039_v36 = vcombine.low %v435_v25, %v439_v26  ;;  %v457_v13 = vld [vmem:[#allocation2 + $0x1b8] sm:$0xff] }
  0x36   : > { %789 = vmatpush1.bf16.msra.mxu0 %v2053_v19  ;;  %830 = vmatpush1.bf16.msra.mxu1 %v2055_v20  ;;  %v430_v32 = vld [vmem:[#allocation2 + $0xe0] sm:$0xff]  ;;  %v431_v34 = vld [vmem:[#allocation2 + $0xe8] sm:$0xff]  ;;  %v444_v17 = vld [vmem:[#allocation2 + $0x150] sm:$0xff]  ;;  %v2060_v19 = vcombine.high %v453_v11, %v457_v13  ;;  %v2059_v25 = vcombine.low %v453_v11, %v457_v13 }
  0x37   : > { %790 = vmatprep.subr.bf16.mxu0 %v2046_v21  ;;  %831 = vmatprep.subr.bf16.mxu1 %v2048_v22  ;;  %v2030_v37 = vcombine.high %v426_v31, %v430_v32  ;;  %v2032_v38 = vcombine.high %v427_v33, %v431_v34  ;;  %v418_v39 = vld [vmem:[#allocation2 + $0x80] sm:$0xff]  ;;  %v419_v41 = vld [vmem:[#allocation2 + $0x88] sm:$0xff]  ;;  %v2029_v43 = vcombine.low %v426_v31, %v430_v32  ;;  %v448_v18 = vld [vmem:[#allocation2 + $0x170] sm:$0xff] }
  0x38   : > { %v422_v40 = vld [vmem:[#allocation2 + $0xa0] sm:$0xff]  ;;  %v423_v42 = vld [vmem:[#allocation2 + $0xa8] sm:$0xff]  ;;  %v2031_v44 = vcombine.low %v427_v33, %v431_v34  ;;  %v445_v20 = vld [vmem:[#allocation2 + $0x158] sm:$0xff]  ;;  %v2057_v22 = vcombine.low %v452_v8, %v456_v10  ;;  %v2050_v26 = vcombine.high %v444_v17, %v448_v18 }
  0x39   : > { %v2022_v45 = vcombine.high %v418_v39, %v422_v40  ;;  %v2024_v46 = vcombine.high %v419_v41, %v423_v42  ;;  %v410_v47 = vld [vmem:[#allocation2 + $0x40] sm:$0xff]  ;;  %v411_v49 = vld [vmem:[#allocation2 + $0x48] sm:$0xff]  ;;  %v2021_v51 = vcombine.low %v418_v39, %v422_v40  ;;  %v2023_v52 = vcombine.low %v419_v41, %v423_v42  ;;  %v449_v21 = vld [vmem:[#allocation2 + $0x178] sm:$0xff] }
  0x3a   : > { %791 = vmatpush1.bf16.msra.mxu0 %v2045_v27  ;;  %832 = vmatpush1.bf16.msra.mxu1 %v2047_v28  ;;  %v414_v48 = vld [vmem:[#allocation2 + $0x60] sm:$0xff]  ;;  %v415_v50 = vld [vmem:[#allocation2 + $0x68] sm:$0xff]  ;;  %v436_v23 = vld [vmem:[#allocation2 + $0x110] sm:$0xff]  ;;  %v2051_v33 = vcombine.low %v445_v20, %v449_v21 }
  0x3b   : > { %792 = vmatprep.subr.bf16.mxu0 %v2038_v29  ;;  %833 = vmatprep.subr.bf16.mxu1 %v2040_v30  ;;  %v2014_v53 = vcombine.high %v410_v47, %v414_v48  ;;  %v402_v54 = vld [vmem:[#allocation2] sm:$0xff]  ;;  %v2016_v55 = vcombine.high %v411_v49, %v415_v50  ;;  %v403_v57 = vld [vmem:[#allocation2 + $0x8] sm:$0xff]  ;;  %v2013_v59 = vcombine.low %v410_v47, %v414_v48  ;;  %v440_v24 = vld [vmem:[#allocation2 + $0x130] sm:$0xff] }
  0x3c   : > { %v406_v56 = vld [vmem:[#allocation2 + $0x20] sm:$0xff]  ;;  %v407_v58 = vld [vmem:[#allocation2 + $0x28] sm:$0xff]  ;;  %v2015_v60 = vcombine.low %v411_v49, %v415_v50  ;;  %v437_v27 = vld [vmem:[#allocation2 + $0x118] sm:$0xff]  ;;  %v2052_v29 = vcombine.high %v445_v20, %v449_v21  ;;  %v2049_v30 = vcombine.low %v444_v17, %v448_v18  ;;  %v2042_v34 = vcombine.high %v436_v23, %v440_v24 }
  0x3d   : > { %v2006_v61 = vcombine.high %v402_v54, %v406_v56  ;;  %v2008_v63 = vcombine.high %v403_v57, %v407_v58  ;;  %v2005_v4 = vcombine.low %v402_v54, %v406_v56  ;;  %v400_v5 = vld [vmem:[%s392_s19] sm:$0xff]  ;;  %v2007_v6 = vcombine.low %v403_v57, %v407_v58  ;;  %v441_v28 = vld [vmem:[#allocation2 + $0x138] sm:$0xff]  ;;  %v428_v31 = vld [vmem:[#allocation2 + $0xd0] sm:$0xff] }
  0x3e   : > { %793 = vmatpush1.bf16.msra.mxu0 %v2037_v35  ;;  %834 = vmatpush1.bf16.msra.mxu1 %v2039_v36  ;;  %v2666_v12 = vpack.c.bf16 %v400_v5, %v400_v5  ;;  %v432_v32 = vld [vmem:[#allocation2 + $0xf0] sm:$0xff]  ;;  %v429_v35 = vld [vmem:[#allocation2 + $0xd8] sm:$0xff]  ;;  %v2043_v41 = vcombine.low %v437_v27, %v441_v28 }
  0x3f   : > { %794 = vmatprep.subr.bf16.mxu0 %v2030_v37  ;;  %835 = vmatprep.subr.bf16.mxu1 %v2032_v38  ;;  %v433_v36 = vld [vmem:[#allocation2 + $0xf8] sm:$0xff]  ;;  %v2044_v37 = vcombine.high %v437_v27, %v441_v28  ;;  %v2041_v38 = vcombine.low %v436_v23, %v440_v24  ;;  %v420_v39 = vld [vmem:[#allocation2 + $0x90] sm:$0xff] }
  0x40   : > { %v424_v40 = vld [vmem:[#allocation2 + $0xb0] sm:$0xff]  ;;  %v421_v42 = vld [vmem:[#allocation2 + $0x98] sm:$0xff]  ;;  %v2035_v48 = vcombine.low %v429_v35, %v433_v36 }
  0x41   : > { %v416_v47 = vld [vmem:[#allocation2 + $0x70] sm:$0xff]  ;;  %v2026_v49 = vcombine.high %v420_v39, %v424_v40  ;;  %v413_v50 = vld [vmem:[#allocation2 + $0x58] sm:$0xff] }
  0x42   : > { %795 = vmatpush1.bf16.msra.mxu0 %v2029_v43  ;;  %836 = vmatpush1.bf16.msra.mxu1 %v2031_v44  ;;  %v425_v43 = vld [vmem:[#allocation2 + $0xb8] sm:$0xff]  ;;  %v2036_v44 = vcombine.high %v429_v35, %v433_v36  ;;  %v404_v54 = vld [vmem:[#allocation2 + $0x10] sm:$0xff] }
  0x43   : > { %796 = vmatprep.subr.bf16.mxu0 %v2022_v45  ;;  %837 = vmatprep.subr.bf16.mxu1 %v2024_v46  ;;  %v2033_v45 = vcombine.low %v428_v31, %v432_v32  ;;  %v412_v46 = vld [vmem:[#allocation2 + $0x50] sm:$0xff]  ;;  %v2027_v56 = vcombine.low %v421_v42, %v425_v43  ;;  %v405_v58 = vld [vmem:[#allocation2 + $0x18] sm:$0xff] }
  0x44   : > { %v2018_v57 = vcombine.high %v412_v46, %v416_v47  ;;  %v2292_v2 = vld [vmem:[#allocation5 + $0xe4] ss:$16 sps:$4 sm:$0xff]   ;;  %v2296_v10 = vld [vmem:[#allocation5 + $0xc0] ss:$16 sps:$4 sm:$0xff]   ;;  %v2299_v11 = vld [vmem:[#allocation5 + $0xc8] ss:$16 sps:$4 sm:$0xff]  }
  0x45   : > { %v2298_v8 = vld [vmem:[#allocation5 + $0xc4] ss:$16 sps:$4 sm:$0xff]   ;;  %v2313_v18 = vld [vmem:[#allocation5 + $0x8c] ss:$16 sps:$4 sm:$0xff]   ;;  %v2311_v20 = vld [vmem:[#allocation5 + $0x88] ss:$16 sps:$4 sm:$0xff]  }
  0x46   : > { %797 = vmatpush1.bf16.msra.mxu0 %v2021_v51  ;;  %838 = vmatpush1.bf16.msra.mxu1 %v2023_v52  ;;  %v417_v51 = vld [vmem:[#allocation2 + $0x78] sm:$0xff]  ;;  %v2028_v52 = vcombine.high %v421_v42, %v425_v43  ;;  %v2304_v13 = vld [vmem:[#allocation5 + $0xa4] ss:$16 sps:$4 sm:$0xff]  }
  0x47   : > { %798 = vmatprep.subr.bf16.mxu0 %v2014_v53  ;;  %839 = vmatprep.subr.bf16.mxu1 %v2016_v55  ;;  %v2025_v53 = vcombine.low %v420_v39, %v424_v40  ;;  %v408_v55 = vld [vmem:[#allocation2 + $0x30] sm:$0xff]  ;;  %v2019_v62 = vcombine.low %v413_v50, %v417_v51  ;;  %v2317_v23 = vld [vmem:[#allocation5 + $0x68] ss:$16 sps:$4 sm:$0xff]   ;;  %v2337_v35 = vld [vmem:[#allocation5 + $0xc] ss:$16 sps:$4 sm:$0xff]  }
  0x48   : > { %v2009_v3 = vcombine.low %v404_v54, %v408_v55  ;;  %v2310_v17 = vld [vmem:[#allocation5 + $0x84] ss:$16 sps:$4 sm:$0xff]   ;;  %v2323_v27 = vld [vmem:[#allocation5 + $0x48] ss:$16 sps:$4 sm:$0xff]  }
  0x49   : > { %v2316_v21 = vld [vmem:[#allocation5 + $0x64] ss:$16 sps:$4 sm:$0xff]   ;;  %v2341_v39 = vld [vmem:[#allocation5 + $0x1e8] ss:$16 sps:$4 sm:$0xff]  }
  0x4a   : > { %799 = vmatpush1.bf16.msra.mxu0 %v2013_v59  ;;  %840 = vmatpush1.bf16.msra.mxu1 %v2015_v60  ;;  %v409_v59 = vld [vmem:[#allocation2 + $0x38] sm:$0xff]  ;;  %v2020_v60 = vcombine.high %v413_v50, %v417_v51  ;;  %v2322_v24 = vld [vmem:[#allocation5 + $0x44] ss:$16 sps:$4 sm:$0xff]  }
  0x4b   : > { %800 = vmatprep.subr.bf16.mxu0 %v2006_v61  ;;  %841 = vmatprep.subr.bf16.mxu1 %v2008_v63  ;;  %v2017_v61 = vcombine.low %v412_v46, %v416_v47  ;;  %v2010_v63 = vcombine.high %v404_v54, %v408_v55  ;;  %v2012_v1 = vcombine.high %v405_v58, %v409_v59  ;;  %v2328_v28 = vld [vmem:[#allocation5 + $0x24] ss:$16 sps:$4 sm:$0xff]   ;;  %v2347_v42 = vld [vmem:[#allocation5 + $0x1c8] ss:$16 sps:$4 sm:$0xff]  }
  0x4c   : > { %v2011_v5 = vcombine.low %v405_v58, %v409_v59  ;;  %v2340_v36 = vld [vmem:[#allocation5 + $0x1e4] ss:$16 sps:$4 sm:$0xff]   ;;  %v2353_v46 = vld [vmem:[#allocation5 + $0x1a8] ss:$16 sps:$4 sm:$0xff]  }
  0x4d   : > { %v2346_v40 = vld [vmem:[#allocation5 + $0x1c4] ss:$16 sps:$4 sm:$0xff]   ;;  %v2359_v50 = vld [vmem:[#allocation5 + $0x188] ss:$16 sps:$4 sm:$0xff]  }
  0x4e   : > { %801 = vmatpush1.bf16.msra.mxu0 %v2005_v4  ;;  %842 = vmatpush1.bf16.msra.mxu1 %v2007_v6  ;;  %v2295_v4 = vld [vmem:[#allocation5 + $0xec] ss:$16 sps:$4 sm:$0xff]   ;;  %v2290_v6 = vld [vmem:[#allocation5 + $0xe0] ss:$16 sps:$4 sm:$0xff]   ;;  %v2352_v43 = vld [vmem:[#allocation5 + $0x1a4] ss:$16 sps:$4 sm:$0xff]  }
  0x4f   : > { %868 = vmatprep.subr.bf16.mxu0 %v2066_v7  ;;  %909 = vmatprep.subr.bf16.mxu1 %v2068_v9  ;;  %v2293_v7 = vld [vmem:[#allocation5 + $0xe8] ss:$16 sps:$4 sm:$0xff]   ;;  %v2301_v9 = vld [vmem:[#allocation5 + $0xcc] ss:$16 sps:$4 sm:$0xff]   ;;  %v2358_v47 = vld [vmem:[#allocation5 + $0x184] ss:$16 sps:$4 sm:$0xff]  }
  0x50   : > { %v2364_v51 = vld [vmem:[#allocation5 + $0x164] ss:$16 sps:$4 sm:$0xff]   ;;  %v2365_v54 = vld [vmem:[#allocation5 + $0x168] ss:$16 sps:$4 sm:$0xff]  }
  0x51   : > { %819 = vmatmul.mubr.bf16.vlgmr.msra.gmra.mxu0 %v2666_v12  ;;  %860 = vmatmul.mubr.bf16.vlgmr.msra.gmra.mxu1 %v2666_v12  ;;  %v2370_v55 = vld [vmem:[#allocation5 + $0x144] ss:$16 sps:$4 sm:$0xff]   ;;  %v2371_v58 = vld [vmem:[#allocation5 + $0x148] ss:$16 sps:$4 sm:$0xff]  }
  0x52   : > { %869 = vmatpush1.bf16.msra.mxu0 %v2065_v14  ;;  %910 = vmatpush1.bf16.msra.mxu1 %v2067_v15  ;;  %v2307_v14 = vld [vmem:[#allocation5 + $0xac] ss:$16 sps:$4 sm:$0xff]   ;;  %v2302_v15 = vld [vmem:[#allocation5 + $0xa0] ss:$16 sps:$4 sm:$0xff]   ;;  %v2376_v59 = vld [vmem:[#allocation5 + $0x124] ss:$16 sps:$4 sm:$0xff]  }
  0x53   : > { %870 = vmatprep.subr.bf16.mxu0 %v2058_v16  ;;  %911 = vmatprep.subr.bf16.mxu1 %v2060_v19  ;;  %v2305_v16 = vld [vmem:[#allocation5 + $0xa8] ss:$16 sps:$4 sm:$0xff]   ;;  %v2308_v19 = vld [vmem:[#allocation5 + $0x80] ss:$16 sps:$4 sm:$0xff]  }
  0x54   : > { %900 = vmatprep.mubr.bf16.mxu0 %v2538_v0  ;;  %941 = vmatprep.mubr.bf16.mxu1 %v2538_v0  ;;  %v2034_v0 = vcombine.high %v428_v31, %v432_v32  ;;  %v2329_v31 = vld [vmem:[#allocation5 + $0x28] ss:$16 sps:$4 sm:$0xff]   ;;  %v2334_v32 = vld [vmem:[#allocation5 + $0x4] ss:$16 sps:$4 sm:$0xff]  }
  0x56   : > { %871 = vmatpush1.bf16.msra.mxu0 %v2057_v22  ;;  %912 = vmatpush1.bf16.msra.mxu1 %v2059_v25  ;;  %v2314_v22 = vld [vmem:[#allocation5 + $0x60] ss:$16 sps:$4 sm:$0xff]   ;;  %v2325_v25 = vld [vmem:[#allocation5 + $0x4c] ss:$16 sps:$4 sm:$0xff]  }
  0x57   : > { %872 = vmatprep.subr.bf16.mxu0 %v2050_v26  ;;  %913 = vmatprep.subr.bf16.mxu1 %v2052_v29  ;;  %v2320_v26 = vld [vmem:[#allocation5 + $0x40] ss:$16 sps:$4 sm:$0xff]   ;;  %v2331_v29 = vld [vmem:[#allocation5 + $0x2c] ss:$16 sps:$4 sm:$0xff]  }
  0x5a   : > { %873 = vmatpush1.bf16.msra.mxu0 %v2049_v30  ;;  %914 = vmatpush1.bf16.msra.mxu1 %v2051_v33  ;;  %v2326_v30 = vld [vmem:[#allocation5 + $0x20] ss:$16 sps:$4 sm:$0xff]  }
  0x5b   : > { %874 = vmatprep.subr.bf16.mxu0 %v2042_v34  ;;  %915 = vmatprep.subr.bf16.mxu1 %v2044_v37  ;;  %v2332_v33 = vld [vmem:[#allocation5] ss:$16 sps:$4 sm:$0xff]   ;;  %v2335_v34 = vld [vmem:[#allocation5 + $0x8] ss:$16 sps:$4 sm:$0xff]   ;;  %v2343_v37 = vld [vmem:[#allocation5 + $0x1ec] ss:$16 sps:$4 sm:$0xff]  }
  0x5e   : > { %875 = vmatpush1.bf16.msra.mxu0 %v2041_v38  ;;  %916 = vmatpush1.bf16.msra.mxu1 %v2043_v41  ;;  %v2338_v38 = vld [vmem:[#allocation5 + $0x1e0] ss:$16 sps:$4 sm:$0xff]   ;;  %v2349_v41 = vld [vmem:[#allocation5 + $0x1cc] ss:$16 sps:$4 sm:$0xff]  }
  0x5f   : > { %876 = vmatprep.subr.bf16.mxu0 %v2034_v0  ;;  %917 = vmatprep.subr.bf16.mxu1 %v2036_v44  ;;  %v2344_v0 = vld [vmem:[#allocation5 + $0x1c0] ss:$16 sps:$4 sm:$0xff]   ;;  %v2355_v44 = vld [vmem:[#allocation5 + $0x1ac] ss:$16 sps:$4 sm:$0xff]  }
  0x62   : > { %877 = vmatpush1.bf16.msra.mxu0 %v2033_v45  ;;  %918 = vmatpush1.bf16.msra.mxu1 %v2035_v48  ;;  %v2350_v45 = vld [vmem:[#allocation5 + $0x1a0] ss:$16 sps:$4 sm:$0xff]   ;;  %v2361_v48 = vld [vmem:[#allocation5 + $0x18c] ss:$16 sps:$4 sm:$0xff]  }
  0x63   : > { %878 = vmatprep.subr.bf16.mxu0 %v2026_v49  ;;  %919 = vmatprep.subr.bf16.mxu1 %v2028_v52  ;;  %v2356_v49 = vld [vmem:[#allocation5 + $0x180] ss:$16 sps:$4 sm:$0xff]   ;;  %v2367_v52 = vld [vmem:[#allocation5 + $0x16c] ss:$16 sps:$4 sm:$0xff]  }
  0x66   : > { %879 = vmatpush1.bf16.msra.mxu0 %v2025_v53  ;;  %920 = vmatpush1.bf16.msra.mxu1 %v2027_v56  ;;  %v2362_v53 = vld [vmem:[#allocation5 + $0x160] ss:$16 sps:$4 sm:$0xff]   ;;  %v2373_v56 = vld [vmem:[#allocation5 + $0x14c] ss:$16 sps:$4 sm:$0xff]  }
  0x67   : > { %880 = vmatprep.subr.bf16.mxu0 %v2018_v57  ;;  %921 = vmatprep.subr.bf16.mxu1 %v2020_v60  ;;  %v2368_v57 = vld [vmem:[#allocation5 + $0x140] ss:$16 sps:$4 sm:$0xff]   ;;  %v2379_v60 = vld [vmem:[#allocation5 + $0x12c] ss:$16 sps:$4 sm:$0xff]  }
  0x6a   : > { %881 = vmatpush1.bf16.msra.mxu0 %v2017_v61  ;;  %922 = vmatpush1.bf16.msra.mxu1 %v2019_v62  ;;  %v2374_v61 = vld [vmem:[#allocation5 + $0x120] ss:$16 sps:$4 sm:$0xff]   ;;  %v2377_v62 = vld [vmem:[#allocation5 + $0x128] ss:$16 sps:$4 sm:$0xff]  }
  0x6b   : > { %882 = vmatprep.subr.bf16.mxu0 %v2010_v63  ;;  %923 = vmatprep.subr.bf16.mxu1 %v2012_v1  ;;  %v2382_v63 = vld [vmem:[#allocation5 + $0x104] ss:$16 sps:$4 sm:$0xff]   ;;  %v2385_v1 = vld [vmem:[#allocation5 + $0x10c] ss:$16 sps:$4 sm:$0xff]  }
  0x6e   : > { %883 = vmatpush1.bf16.msra.mxu0 %v2009_v3  ;;  %924 = vmatpush1.bf16.msra.mxu1 %v2011_v5  ;;  %v2383_v3 = vld [vmem:[#allocation5 + $0x108] ss:$16 sps:$4 sm:$0xff]  }
  0x6f   : > { %1380 = vmatprep.subr.bf16.mxu0 %v2292_v2  ;;  %1421 = vmatprep.subr.bf16.mxu1 %v2295_v4  ;;  %v2380_v2 = vld [vmem:[#allocation5 + $0x100] ss:$16 sps:$4 sm:$0xff]   ;;  %v2386_v4 = vld [vmem:[%s2833_s5 + $0x78] sm:$0xff]  }
  0x70   : > { %v2387_v5 = vld [vmem:[%s2833_s5 + $0xf8] sm:$0xff]  }
  0x71   : > { %901 = vmatmul.mubr.bf16.vlgmr.msra.gmra.mxu0 %v2666_v12  ;;  %942 = vmatmul.mubr.bf16.vlgmr.msra.gmra.mxu1 %v2666_v12  ;;  %v2319_v12 = vld [vmem:[#allocation5 + $0x6c] ss:$16 sps:$4 sm:$0xff]  }
  0x72   : > { %1381 = vmatpush1.bf16.msra.mxu0 %v2290_v6  ;;  %1422 = vmatpush1.bf16.msra.mxu1 %v2293_v7 }
  0x73   : > { %1382 = vmatprep.subr.bf16.mxu0 %v2298_v8  ;;  %1423 = vmatprep.subr.bf16.mxu1 %v2301_v9 }
  0x76   : > { %1383 = vmatpush1.bf16.msra.mxu0 %v2296_v10  ;;  %1424 = vmatpush1.bf16.msra.mxu1 %v2299_v11 }
  0x77   : > { %1384 = vmatprep.subr.bf16.mxu0 %v2304_v13  ;;  %1425 = vmatprep.subr.bf16.mxu1 %v2307_v14 }
  0x7a   : > { %1385 = vmatpush1.bf16.msra.mxu0 %v2302_v15  ;;  %1426 = vmatpush1.bf16.msra.mxu1 %v2305_v16  ;;  %v958_v15 = vlaneseq }
  0x7b   : > { %1386 = vmatprep.subr.bf16.mxu0 %v2310_v17  ;;  %1427 = vmatprep.subr.bf16.mxu1 %v2313_v18  ;;  %v956_v18 = vld [vmem:[%s2830_s2] sm:$0x3] }
  0x7c   : > { %v2680_v16 = vshrl.u32 %v958_v15, 7 }
  0x7e   : > { %1387 = vmatpush1.bf16.msra.mxu0 %v2308_v19  ;;  %1428 = vmatpush1.bf16.msra.mxu1 %v2311_v20  ;;  %v960_v17 = vsub.s32 0, %v2680_v16  ;;  %v964_v20 = vsub.s32 1, %v2680_v16 }
  0x7f   : > { %1388 = vmatprep.subr.bf16.mxu0 %v2316_v21  ;;  %1429 = vmatprep.subr.bf16.mxu1 %v2319_v12 }
  0x82   : > { %1389 = vmatpush1.bf16.msra.mxu0 %v2314_v22  ;;  %1430 = vmatpush1.bf16.msra.mxu1 %v2317_v23  ;;  %v961_v23 = vrot.slane %v956_v18, %v960_v17 }
  0x83   : > { %1390 = vmatprep.subr.bf16.mxu0 %v2322_v24  ;;  %1431 = vmatprep.subr.bf16.mxu1 %v2325_v25 }
  0x86   : > { %1391 = vmatpush1.bf16.msra.mxu0 %v2320_v26  ;;  %1432 = vmatpush1.bf16.msra.mxu1 %v2323_v27 }
  0x87   : > { %1392 = vmatprep.subr.bf16.mxu0 %v2328_v28  ;;  %1433 = vmatprep.subr.bf16.mxu1 %v2331_v29  ;;  %v965_v29 = vrot.slane %v956_v18, %v964_v20 }
  0x8a   : > { %1393 = vmatpush1.bf16.msra.mxu0 %v2326_v30  ;;  %1434 = vmatpush1.bf16.msra.mxu1 %v2329_v31 }
  0x8b   : > { %1394 = vmatprep.subr.bf16.mxu0 %v2334_v32  ;;  %1435 = vmatprep.subr.bf16.mxu1 %v2337_v35 }
  0x8e   : > { %1395 = vmatpush1.bf16.msra.mxu0 %v2332_v33  ;;  %1436 = vmatpush1.bf16.msra.mxu1 %v2335_v34 }
  0x8f   : > { %1396 = vmatprep.subr.bf16.mxu0 %v2340_v36  ;;  %1437 = vmatprep.subr.bf16.mxu1 %v2343_v37 }
  0x92   : > { %1397 = vmatpush2.bf16.msra.mxu0 %v2338_v38  ;;  %1438 = vmatpush2.bf16.msra.mxu1 %v2341_v39 }
  0x93   : > { %1398 = vmatprep.subr.bf16.mxu0 %v2346_v40  ;;  %1439 = vmatprep.subr.bf16.mxu1 %v2349_v41  ;;  %v2388_v40 = vld [vmem:[%s2833_s5 + $0x38] sm:$0xff]  }
  0x94   : > { %v2389_v41 = vld [vmem:[%s2833_s5 + $0xb8] sm:$0xff]  }
  0x96   : > { %1399 = vmatpush2.bf16.msra.mxu0 %v2344_v0  ;;  %1440 = vmatpush2.bf16.msra.mxu1 %v2347_v42  ;;  %v2390_v42 = vld [vmem:[%s2833_s5 + $0x70] sm:$0xff]  }
  0x97   : > { %1400 = vmatprep.subr.bf16.mxu0 %v2352_v43  ;;  %1441 = vmatprep.subr.bf16.mxu1 %v2355_v44  ;;  %v2391_v43 = vld [vmem:[%s2833_s5 + $0xf0] sm:$0xff]  }
  0x98   : > { %v2392_v44 = vld [vmem:[%s2833_s5 + $0x30] sm:$0xff]  }
  0x9a   : > { %1401 = vmatpush2.bf16.msra.mxu0 %v2350_v45  ;;  %1442 = vmatpush2.bf16.msra.mxu1 %v2353_v46  ;;  %v2393_v45 = vld [vmem:[%s2833_s5 + $0xb0] sm:$0xff]   ;;  %v2394_v46 = vld [vmem:[%s2833_s5 + $0x68] sm:$0xff]  }
  0x9b   : > { %1402 = vmatprep.subr.bf16.mxu0 %v2358_v47  ;;  %1443 = vmatprep.subr.bf16.mxu1 %v2361_v48  ;;  %v2395_v47 = vld [vmem:[%s2833_s5 + $0xe8] sm:$0xff]  }
  0x9c   : > { %v2396_v48 = vld [vmem:[%s2833_s5 + $0x28] sm:$0xff]  }
  0x9e   : > { %1403 = vmatpush2.bf16.msra.mxu0 %v2356_v49  ;;  %1444 = vmatpush2.bf16.msra.mxu1 %v2359_v50  ;;  %v2397_v49 = vld [vmem:[%s2833_s5 + $0xa8] sm:$0xff]   ;;  %v2398_v50 = vld [vmem:[%s2833_s5 + $0x60] sm:$0xff]  }
  0x9f   : > { %1404 = vmatprep.subr.bf16.mxu0 %v2364_v51  ;;  %1445 = vmatprep.subr.bf16.mxu1 %v2367_v52  ;;  %v2399_v51 = vld [vmem:[%s2833_s5 + $0xe0] sm:$0xff]  }
  0xa0   : > { %v2400_v52 = vld [vmem:[%s2833_s5 + $0x20] sm:$0xff]  }
  0xa2   : > { %1405 = vmatpush2.bf16.msra.mxu0 %v2362_v53  ;;  %1446 = vmatpush2.bf16.msra.mxu1 %v2365_v54  ;;  %v2401_v53 = vld [vmem:[%s2833_s5 + $0xa0] sm:$0xff]   ;;  %v2402_v54 = vld [vmem:[%s2833_s5 + $0x58] sm:$0xff]  }
  0xa3   : > { %1406 = vmatprep.subr.bf16.mxu0 %v2370_v55  ;;  %1447 = vmatprep.subr.bf16.mxu1 %v2373_v56  ;;  %v2403_v55 = vld [vmem:[%s2833_s5 + $0xd8] sm:$0xff]  }
  0xa4   : > { %v2404_v56 = vld [vmem:[%s2833_s5 + $0x18] sm:$0xff]  }
  0xa6   : > { %1407 = vmatpush2.bf16.msra.mxu0 %v2368_v57  ;;  %1448 = vmatpush2.bf16.msra.mxu1 %v2371_v58  ;;  %v2405_v57 = vld [vmem:[%s2833_s5 + $0x98] sm:$0xff]   ;;  %v2406_v58 = vld [vmem:[%s2833_s5 + $0x50] sm:$0xff]  }
  0xa7   : > { %1408 = vmatprep.subr.bf16.mxu0 %v2376_v59  ;;  %1449 = vmatprep.subr.bf16.mxu1 %v2379_v60  ;;  %v2407_v59 = vld [vmem:[%s2833_s5 + $0xd0] sm:$0xff]  }
  0xa8   : > { %v2408_v60 = vld [vmem:[%s2833_s5 + $0x10] sm:$0xff]  }
  0xaa   : > { %1409 = vmatpush2.bf16.msra.mxu0 %v2374_v61  ;;  %1450 = vmatpush2.bf16.msra.mxu1 %v2377_v62  ;;  %v2409_v61 = vld [vmem:[%s2833_s5 + $0x90] sm:$0xff]   ;;  %v2410_v62 = vld [vmem:[%s2833_s5 + $0x48] sm:$0xff]  }
  0xab   : > { %1410 = vmatprep.subr.bf16.mxu0 %v2382_v63  ;;  %1451 = vmatprep.subr.bf16.mxu1 %v2385_v1  ;;  %v2411_v63 = vld [vmem:[%s2833_s5 + $0xc8] sm:$0xff]  }
  0xac   : > { %v2412_v1 = vld [vmem:[%s2833_s5 + $0x8] sm:$0xff]  }
  0xae   : > { %1411 = vmatpush2.bf16.msra.mxu0 %v2380_v2  ;;  %1452 = vmatpush2.bf16.msra.mxu1 %v2383_v3  ;;  %v2413_v2 = vld [vmem:[%s2833_s5 + $0x88] sm:$0xff]   ;;  %v2414_v3 = vld [vmem:[%s2833_s5 + $0x40] sm:$0xff]  }
  0xaf   : > { %2176 = vmatprep.subr.bf16.mxu0 %v2386_v4  ;;  %2198 = vmatprep.subr.bf16.mxu1 %v2387_v5  ;;  %v2415_v4 = vld [vmem:[%s2833_s5 + $0xc0] sm:$0xff]  }
  0xb0   : > { %v2416_v5 = vld [vmem:[%s2833_s5] sm:$0xff]  }
 0x111   : > { %v820_v6 = vpop.f32.mrf.mxu0  ;;  %v861_v7 = vpop.f32.mrf.mxu1 }
 0x112   : > { %v950_v12 = vmax.f32 %v820_v6, %v861_v7  ;;  %v2417_v6 = vld [vmem:[%s2833_s5 + $0x80] sm:$0xff]   ;;  %v1050_v7 = vsub.s32 2, %v2680_v16 }
 0x113   : > { %v822_v8 = vpop.f32.mrf.mxu0  ;;  %v863_v9 = vpop.f32.mrf.mxu1 }
 0x114   : > { %v951_v26 = vmax.f32 %v822_v8, %v863_v9  ;;  %v1038_v8 = vld [vmem:[%s2832_s4] sm:$0xf]  ;;  %v1054_v9 = vsub.s32 3, %v2680_v16 }
 0x115   : > { %v824_v10 = vpop.f32.mrf.mxu0  ;;  %v865_v11 = vpop.f32.mrf.mxu1 }
 0x116   : > { %v1043_v10 = vrot.slane %v1038_v8, %v960_v17  ;;  %v1051_v11 = vrot.slane %v1038_v8, %v1050_v7 }
 0x117   : > { %v825_v13 = vpop.f32.mrf.mxu0  ;;  %v866_v14 = vpop.f32.mrf.mxu1 }
 0x118   : > { %v1047_v13 = vrot.slane %v1038_v8, %v964_v20  ;;  %v1055_v14 = vrot.slane %v1038_v8, %v1054_v9 }
 0x131   : > { %v902_v19 = vpop.f32.mrf.mxu0  ;;  %v943_v21 = vpop.f32.mrf.mxu1 }
 0x132   : > { %v952_v22 = vmax.f32 %v902_v19, %v943_v21 }
 0x133   : > { %v904_v24 = vpop.f32.mrf.mxu0  ;;  %v945_v25 = vpop.f32.mrf.mxu1 }
 0x134   : > { %v954_v27 = vmax.f32 %v950_v12, %v952_v22  ;;  %v953_v28 = vmax.f32 %v904_v24, %v945_v25 }
 0x135   : > { %v906_v30 = vpop.f32.mrf.mxu0  ;;  %v947_v31 = vpop.f32.mrf.mxu1 }
 0x136   : > { %v968_v32 = vadd.f32 %v961_v23, %v954_v27  ;;  %v955_v33 = vmax.f32 %v951_v26, %v953_v28 }
 0x137   : > { %v907_v34 = vpop.f32.mrf.mxu0  ;;  %v948_v35 = vpop.f32.mrf.mxu1 }
 0x138   : > { %v969_v36 = vadd.f32 %v965_v29, %v955_v33  ;;  %v970_v37 = vmax.f32 %v968_v32, 0.0  ;;  %v2418_v34 = vld [vmem:[%s397_s28 + $0x8] sm:$0xff]   ;;  %v2539_v35 = vmov 0.0  }
 0x13a   : > { %v971_v38 = vmax.f32 %v969_v36, 0.0  ;;  %v972_v0 = vpack.c.bf16 %v970_v37, %v970_v37  ;;  %v2419_v36 = vld [vmem:[%s397_s28] sm:$0xff]  }
 0x13c   : > { %v973_v39 = vpack.c.bf16 %v971_v38, %v971_v38 }
 0x13e   : > { %1412 = vmatprep.mubr.bf16.mxu0 %v973_v39  ;;  %1453 = vmatprep.mubr.bf16.mxu1 %v973_v39  ;;  %v2133_v39 = vld [vmem:[%s2834_s6] ss:$0 sm:$0xff] }
 0x13f   : > { %1413 = vmatmul.mubr.bf16.vlgmr.msra.gmra.mxu0 %v972_v0  ;;  %1454 = vmatmul.mubr.bf16.vlgmr.msra.gmra.mxu1 %v972_v0 }
 0x140   : > { %2177 = vmatpush3.bf16.msra.mxu0 %v2388_v40  ;;  %2199 = vmatpush3.bf16.msra.mxu1 %v2389_v41 }
 0x141   : > { %2178 = vmatprep.subr.bf16.mxu0 %v2390_v42  ;;  %2200 = vmatprep.subr.bf16.mxu1 %v2391_v43 }
 0x144   : > { %2179 = vmatpush3.bf16.msra.mxu0 %v2392_v44  ;;  %2201 = vmatpush3.bf16.msra.mxu1 %v2393_v45 }
 0x145   : > { %2180 = vmatprep.subr.bf16.mxu0 %v2394_v46  ;;  %2202 = vmatprep.subr.bf16.mxu1 %v2395_v47 }
 0x148   : > { %2181 = vmatpush3.bf16.msra.mxu0 %v2396_v48  ;;  %2203 = vmatpush3.bf16.msra.mxu1 %v2397_v49 }
 0x149   : > { %2182 = vmatprep.subr.bf16.mxu0 %v2398_v50  ;;  %2204 = vmatprep.subr.bf16.mxu1 %v2399_v51 }
 0x14c   : > { %2183 = vmatpush3.bf16.msra.mxu0 %v2400_v52  ;;  %2205 = vmatpush3.bf16.msra.mxu1 %v2401_v53 }
 0x14d   : > { %2184 = vmatprep.subr.bf16.mxu0 %v2402_v54  ;;  %2206 = vmatprep.subr.bf16.mxu1 %v2403_v55 }
 0x150   : > { %2185 = vmatpush3.bf16.msra.mxu0 %v2404_v56  ;;  %2207 = vmatpush3.bf16.msra.mxu1 %v2405_v57 }
 0x151   : > { %2186 = vmatprep.subr.bf16.mxu0 %v2406_v58  ;;  %2208 = vmatprep.subr.bf16.mxu1 %v2407_v59 }
 0x154   : > { %2187 = vmatpush3.bf16.msra.mxu0 %v2408_v60  ;;  %2209 = vmatpush3.bf16.msra.mxu1 %v2409_v61 }
 0x155   : > { %2188 = vmatprep.subr.bf16.mxu0 %v2410_v62  ;;  %2210 = vmatprep.subr.bf16.mxu1 %v2411_v63 }
 0x158   : > { %2189 = vmatpush3.bf16.msra.mxu0 %v2412_v1  ;;  %2211 = vmatpush3.bf16.msra.mxu1 %v2413_v2 }
 0x159   : > { %2190 = vmatprep.subr.bf16.mxu0 %v2414_v3  ;;  %2212 = vmatprep.subr.bf16.mxu1 %v2415_v4 }
 0x15c   : > { %2191 = vmatpush3.bf16.msra.mxu0 %v2416_v5  ;;  %2213 = vmatpush3.bf16.msra.mxu1 %v2417_v6 }
 0x15d   : > { %2223 = vmatprep.subr.bf16.mxu0 %v2539_v35 }
 0x1ff   : > { %v1414_v15 = vpop.f32.mrf.mxu0  ;;  %v1455_v18 = vpop.f32.mrf.mxu1 }
 0x200   : > { %v1415_v19 = vadd.f32 %v1414_v15, %v1043_v10  ;;  %v1456_v21 = vadd.f32 %v1455_v18, %v1051_v11 }
 0x201   : > { %v1416_v12 = vpop.f32.mrf.mxu0  ;;  %v1457_v22 = vpop.f32.mrf.mxu1 }
 0x202   : > { %v1417_v23 = vadd.f32 %v1416_v12, %v1047_v13  ;;  %v1458_v24 = vadd.f32 %v1457_v22, %v1055_v14  ;;  %v1462_v25 = vmax.f32 %v1415_v19, 0.0  ;;  %v1464_v26 = vmax.f32 %v1456_v21, 0.0 }
 0x203   : > { %v1418_v27 = vpop.f32.mrf.mxu0  ;;  %v1459_v28 = vpop.f32.mrf.mxu1 }
 0x204   : > { %v1463_v29 = vmax.f32 %v1417_v23, 0.0  ;;  %v1465_v17 = vmax.f32 %v1458_v24, 0.0  ;;  %v1466_v32 = vpack.c.bf16 %v1462_v25, %v1462_v25  ;;  %v1468_v33 = vpack.c.bf16 %v1464_v26, %v1464_v26 }
 0x205   : > { %v1419_v30 = vpop.f32.mrf.mxu0  ;;  %v1460_v31 = vpop.f32.mrf.mxu1 }
 0x206   : > { %v1467_v16 = vpack.c.bf16 %v1463_v29, %v1463_v29  ;;  %v1469_v20 = vpack.c.bf16 %v1465_v17, %v1465_v17 }
 0x208   : > { %1765 = vmatprep.mubr.bf16.mxu0 %v1467_v16  ;;  %1805 = vmatprep.mubr.bf16.mxu1 %v1469_v20 }
 0x209   : > { %1766 = vmatmul.mubr.bf16.vlgmr.msra.gmra.mxu0 %v1466_v32  ;;  %1806 = vmatmul.mubr.bf16.vlgmr.msra.gmra.mxu1 %v1468_v33 }
 0x20a   : > { %2224 = vmatpush3.bf16.msra.mxu0 %v2418_v34  ;;  %2227 = vmatprep.mubr.msk.bf16.mxu0 %vm2540_vm0, %v2539_v35 }
 0x20b   : > { %2225 = vmatprep.subr.bf16.mxu0 %v2539_v35 }
 0x20e   : > { %2226 = vmatpush3.bf16.msra.mxu0 %v2419_v36 }
 0x2c9   : > { %v2192_v37 = vpop.f32.mrf.mxu0  ;;  %v2214_v38 = vpop.f32.mrf.mxu1 }
 0x2cb   : > { %v2193_v40 = vpop.f32.mrf.mxu0  ;;  %v2215_v41 = vpop.f32.mrf.mxu1 }
 0x2cc   : > { %v2194_v0 = vadd.f32 %v2193_v40, %v2192_v37  ;;  %v2216_v45 = vadd.f32 %v2215_v41, %v2214_v38 }
 0x2cd   : > { %v2195_v42 = vpop.f32.mrf.mxu0  ;;  %v2217_v43 = vpop.f32.mrf.mxu1 }
 0x2ce   : > { %v1768_v44 = vadd.f32 %v2194_v0, %v2133_v39 }
 0x2cf   : > { %v2196_v46 = vpop.f32.mrf.mxu0  ;;  %v2218_v47 = vpop.f32.mrf.mxu1 }
 0x2d0   : > { %v1808_v48 = vadd.f32 %v2216_v45, %v1768_v44 }
 0x2d2   : > { %v1813_v49 = vmax.f32 %v1808_v48, 0.0 }
 0x2d4   : > { %v1814_v50 = vpack.c.bf16 %v1813_v49, %v1813_v49 }
 0x2d6   : > { %2228 = vmatmul.mubr.msk.bf16.vlgmr.msra.gmra.mxu0 %vm1831_vm1, %v1814_v50 }
 0x396   : > { %v1869_v51 = vpop.f32.mrf.mxu0 }
 0x398   : > { %v2229_v52 = vpop.f32.mrf.mxu0  ;;  %1878 = sbr.rel (%p2169_p6) target bundleno = 929 (0x3a1), region = 68 }
 0x39a   : > { %v1872_v53 = vpop.f32.mrf.mxu0 }
 0x39c   : > { %v2230_v54 = vpop.f32.mrf.mxu0 }
 0x39d   : > { %v2170_v55 = vld [vmem:[%s2836_s8] ss:$0 sm:$0xff] }
 0x39e   : > { %v1886_v56 = vadd.f32 %v2170_v55, %v1869_v51 }
 0x3a0   : > { %1887 = vst [vmem:[#allocation7] sm:$0xff] %v1886_v56 }
 0x3a1 PF: > { %p2171_p7 = scmp.eq.s32.totalorder %s2522_s30, 0 }
 0x3a3   : > { %1891 = sbr.rel (%p2171_p7) target bundleno = 940 (0x3ac), region = 72 }
 0x3a8   : > { %v1892_v57 = vld [vmem:[#allocation7] sm:$0xff] }
 0x3a9   : > { %v1893_v58 = vadd.f32 %v1892_v57, %v1869_v51 }
 0x3ab   : > { %1894 = vst [vmem:[#allocation7] sm:$0xff] %v1893_v58 }
 0x3ac PF: > { %p2804_p12 = scmp.eq.s32.totalorder %s1994_s12, 1  ;;  %s2541_s18 = smov [#allocation7]  }
 0x3ad   : > { %s1904_s19 = sshll.u32 %s2541_s18, 4  ;;  %s1905_s19 = int_to_ptr.vmem [resolvable:$true] %s1904_s19 }
 0x3ae   : > { %s2472_s20 = scalar_lea.vmem %s1905_s19, 128  ;;  %p2479_p2 = scmp.lt.s32.totalorder %s1905_s19, %s1905_s19 }
 0x3af   : > { %p2473_p13 = scmp.ne.s32.totalorder %s1905_s19, %s2472_s20  ;;  %p2480_p5 = scmp.lt.s32.totalorder %s2472_s20, %s2472_s20 }
 0x3b1   : > { %p2474_p0 = pnand %p2473_p13, %p2804_p12  ;;  %p2481_p8 = por %p2480_p5, %p2479_p2 }
 0x3b3   : > { %p2475_p1 = pneg %p2474_p0 }
 0x3b5   : > { %p2482_p9 = pnand %p2481_p8, %p2475_p1 }
 0x3b7   : > { %2485 = shalt.err (!%p2482_p9)
}
 0x3b8   : > { %2240 = dma.vmem_to_hbm [thread:$0]  (%p2804_p12), %s1905_s19, 128, %s2837_s9, [#allocation4]  }
 0x3b9   : > { %2517 = dma.done.wait (%p2804_p12), [#allocation4], 128  }
 0x3ba   : > { %2519 = vsyncadd (%p2804_p12), [#allocation4], 4294967168 }
 0x3bb PF: > { %s22_s11 = sadd.s32 1, %s2530_s11   ;;  %s2842_s30 = smov %s2526_s10 }
 0x3bc   : > { %p19_p11 = scmp.ge.s32.totalorder %s22_s11, 4   ;;  %s2843_s10 = smov %s2845_s13 }
 0x3be   :  { %21 = sbr.rel (!%p19_p11) target bundleno = 4 (0x4), region = 104 }
 0x3c3   :  { %1917 = vsyncpa [#allocation3], 1 }
 0x3c4   :  { %1919 = vsyncpa [#allocation3 + $0x1], 1 }
 0x3c5   :  { %1920 = vsyncpa [#allocation6], 1 }
 0x3c6   :  { %1921 = vsyncpa [#allocation4], 1 }
 0x3c7   :  { %1923 = vsyncpa [#allocation4 + $0x1], 1 }

</bundles_post_ra>
